<compile_context>
chip_gen: v7x
topology: tpu7x:2x2x1
jax: 0.10.0
libtpu: 0.0.40
codegen_flags: <defaults>
</compile_context>

<pallas_src>
import functools

import jax
import jax.numpy as jnp
import numpy as np
from jax.experimental import pallas as pl
from jax.experimental.pallas import tpu as pltpu

# TODO(synk): labels are assumed non-negative and < _LABEL_BASE (65536); widen
# the key packing (or fall back to a two-pass select) for larger label ranges.
_LABEL_BASE = 1 << 16
_BIG_KEY = np.int32(np.iinfo(np.int32).max)


def _round_up(x, m):
    return (x + m - 1) // m * m


def _vmem_capacity_bytes():
    """Physical VMEM of the local TPU generation (fallback: v7x's 64 MiB)."""
    try:
        info = pltpu.get_tpu_info()
        for name in ("vmem_capacity_bytes", "vmem_size_bytes", "vmem_bytes"):
            v = getattr(info, name, None)
            if v:
                return int(v)
    except Exception:
        pass
    return 64 * 1024 * 1024


def _est_vmem_bytes(tb, td, c_pad, in_item, out_item, acc_in_out):
    """Rough per-step VMEM footprint (lane/sublane padded, double-buffered)."""
    lane = lambda n: _round_up(max(int(n), 1), 128)
    sub = lambda n: _round_up(max(int(n), 1), 8)
    b = 2 * sub(tb) * lane(td) * in_item            # z tile (double-buffered)
    b += 2 * 2 * 8 * lane(tb) * 4                   # ch_ids + y tiles
    b += 2 * sub(c_pad) * lane(1) * 4               # uniq
    b += 2 * sub(c_pad) * lane(td) * out_item       # z_ch output block
    b += 2 * sub(c_pad) * lane(1) * 4               # y_ch output block
    b += 2 * sub(c_pad) * lane(1) * 4               # cnt + key scratch
    if not acc_in_out:
        b += sub(c_pad) * lane(td) * 4              # f32 accumulator scratch
    b += sub(c_pad) * lane(tb) * 8                  # mask / packed-key temps
    b += sub(tb) * lane(td) * 4                     # z select / cast temps
    return b


def _channel_aggr_kernel(uniq_ref, ch_ids_ref, y_ref, z_ref,
                         z_ch_ref, y_ch_ref,
                         cnt_ref, key_ref, acc_ref=None, *,
                         reduction, total_batch, ragged_last, dot_dtype):
    # Grid: (j = D-chunk, "parallel") x (k = batch tile, "arbitrary" reduction).
    # uniq_ref:   (C_pad, 1) int32   sorted unique channel ids, -1 padding
    # ch_ids_ref: (1, TB)    int32   channel id per batch row (0 padding)
    # y_ref:      (1, TB)    int32   label per batch row
    # z_ref:      (TB, TD)           latent chunk (last batch tile may be ragged)
    # z_ch_ref:   (C_pad, TD)        output chunk (also the f32 accumulator when
    #                                acc_ref is None)
    # y_ch_ref:   (C_pad, 1) int32   per-D-chunk copy of the channel labels
    # cnt_ref:    (C_pad, 1) f32     per-channel counts (reset each D-chunk pass)
    # key_ref:    (C_pad, 1) i32     first-occurrence packed key (idx*BASE+label)
    # acc_ref:    (C_pad, TD) f32    accumulator scratch (only for non-f32 out)
    k = pl.program_id(1)
    nk = pl.num_programs(1)
    acc = z_ch_ref if acc_ref is None else acc_ref

    @pl.when(k == 0)
    def _init():
        acc[...] = jnp.zeros_like(acc)
        cnt_ref[...] = jnp.zeros_like(cnt_ref)
        # Padded channel rows (uniq == -1) start "already set" so the scalar
        # gate below can close once every real channel has seen a row.
        key_ref[...] = jnp.where(uniq_ref[...] < 0, 0, _BIG_KEY).astype(jnp.int32)

    ch = ch_ids_ref[...]                         # (1, TB)
    uq = uniq_ref[...]                           # (C_pad, 1)
    mask_bool = ch == uq                         # (C_pad, TB), built once per tile

    # z tile: zero the rows past the true batch size on the ragged last tile
    # BEFORE the dot (0-mask * NaN garbage would still poison the accumulator).
    z_tile = z_ref[...]
    tb = z_tile.shape[0]
    if ragged_last:
        row = jax.lax.broadcasted_iota(jnp.int32, (tb, 1), 0)
        valid = (k * tb + row) < total_batch
        z_tile = jnp.where(valid, z_tile, jnp.zeros_like(z_tile))
    if z_tile.dtype != dot_dtype:
        z_tile = z_tile.astype(dot_dtype)

    # Segment-sum on the MXU (0/1 mask is exact in bf16).
    mask = mask_bool.astype(dot_dtype)
    acc[...] += jnp.dot(mask, z_tile, preferred_element_type=jnp.float32)

    # Per-channel counts; bool reduce with f32 accumulation (no extra f32 cast).
    cnt_ref[...] += jnp.sum(mask_bool, axis=1, dtype=jnp.float32, keepdims=True)

    # First-occurrence label: masked min over packed key; skipped entirely once
    # every channel has already been assigned a label (cold path after the
    # first few batch tiles).
    @pl.when(jnp.max(key_ref[...]) == _BIG_KEY)
    def _labels():
        y_row = y_ref[...]                                       # (1, TB)
        bidx = jax.lax.broadcasted_iota(jnp.int32, mask_bool.shape, 1)
        keyv = jnp.where(mask_bool, bidx * _LABEL_BASE + y_row, _BIG_KEY)
        tile_min = jnp.min(keyv, axis=1, keepdims=True)          # (C_pad, 1)
        # Earlier batch tiles win: only fill rows that are still unset.
        key_ref[...] = jnp.where(key_ref[...] == _BIG_KEY, tile_min, key_ref[...])

    @pl.when(k == nk - 1)
    def _finalize():
        agg = acc[...]
        if reduction == "mean":
            cnt = jnp.maximum(cnt_ref[...], 1.0)     # padded rows: avoid 0-div
            inv = pl.reciprocal(cnt, approx=True)    # EUP vrcp (free slot)
            inv = inv * (2.0 - cnt * inv)            # one Newton step
            agg = agg * inv
        z_ch_ref[...] = agg.astype(z_ch_ref.dtype)
        keyv = key_ref[...]
        y_ch_ref[...] = jnp.where(keyv == _BIG_KEY, 0,
                                  keyv & (_LABEL_BASE - 1)).astype(jnp.int32)


def channel_aggregator(z, y, ch_ids, reduction="mean", unique_ch_ids=None,
                       block_b=1024, d_block=512, mxu_dtype=None):
    """JAX/Pallas equivalent of ChannelAggregator.forward.

    z:      (batch, latent_dim) float array (f32 or bf16)
    y:      (batch,) int labels (assumed in [0, 65536))
    ch_ids: (batch,) positive int channel ids
    unique_ch_ids: optional precomputed sorted unique channel ids (numpy).
        Pass this to avoid a host np.unique sync and make the call jittable.
    mxu_dtype: optional dtype (e.g. jnp.bfloat16) for the segment-sum matmul
        operands; useful on v5e when C is large enough to be MXU-bound.
    returns (z_ch (num_channels, latent_dim), y_ch (num_channels,))
    """
    if reduction not in ("mean", "sum"):
        raise ValueError("Invalid reduction method. Choose between 'mean' or 'sum'.")

    z = jnp.asarray(z)
    B, D = z.shape
    out_dtype = z.dtype
    in_item = jnp.dtype(out_dtype).itemsize
    out_item = in_item
    dot_dtype = jnp.dtype(mxu_dtype) if mxu_dtype is not None else jnp.dtype(out_dtype)
    acc_in_out = jnp.dtype(out_dtype) == jnp.dtype(jnp.float32)

    if unique_ch_ids is None:
        # Host fallback; NOT jit-safe (forces a device->host sync like torch.unique).
        unique_ch_ids = np.unique(np.asarray(ch_ids))
    uniq = np.asarray(unique_ch_ids, dtype=np.int32).reshape(-1)
    C = int(uniq.shape[0])
    C_pad = _round_up(C, 8)

    # ---- D tiling: split into a "parallel" grid axis when D is 128-aligned ----
    d_block = max(128, (int(d_block) // 128) * 128)
    if D % 128 == 0 and D > d_block:
        TD = max(t for t in range(128, d_block + 1, 128) if D % t == 0)
    else:
        TD = D                      # full last dim (legal even if D % 128 != 0)
    num_d = D // TD

    # ---- batch tiling + generation-aware VMEM budget (re-tile, don't clamp) ----
    TB = _round_up(min(int(block_b), B), 128)
    TB = min(TB, 2048)              # keeps TB * _LABEL_BASE well below int32 max
    budget = int(0.70 * _vmem_capacity_bytes())
    while (_est_vmem_bytes(TB, TD, C_pad, in_item, out_item, acc_in_out) > budget
           and TB > 128):
        TB = max(128, (TB // 2) // 128 * 128)
    est = _est_vmem_bytes(TB, TD, C_pad, in_item, out_item, acc_in_out)
    vmem_limit = int(min(max(est + (4 << 20), 32 << 20), max(budget, 32 << 20)))
    vmem_limit = int(max(vmem_limit, est + (2 << 20)))
    # TODO(synk): if est still exceeds the physical budget (huge C_pad * TD),
    # split the channel axis over an extra grid dimension as well.

    num_tiles = pl.cdiv(B, TB)
    B_pad = num_tiles * TB
    ragged = B_pad != B

    # ---- tiny padded metadata rows (z itself is NOT copied) ----
    uniq_np = np.full((C_pad, 1), -1, dtype=np.int32)
    uniq_np[:C, 0] = uniq
    uniq_p = jnp.asarray(uniq_np)
    ch_row = jnp.asarray(ch_ids, dtype=jnp.int32).reshape(1, B)
    y_row = jnp.asarray(y, dtype=jnp.int32).reshape(1, B)
    if ragged:
        ch_row = jnp.pad(ch_row, ((0, 0), (0, B_pad - B)))   # 0 matches nothing
        y_row = jnp.pad(y_row, ((0, 0), (0, B_pad - B)))

    kernel = functools.partial(
        _channel_aggr_kernel, reduction=reduction, total_batch=B,
        ragged_last=ragged, dot_dtype=dot_dtype)

    scratch_shapes = [pltpu.VMEM((C_pad, 1), jnp.float32),   # counts
                      pltpu.VMEM((C_pad, 1), jnp.int32)]     # first-occurrence key
    if not acc_in_out:
        scratch_shapes.append(pltpu.VMEM((C_pad, TD), jnp.float32))  # f32 acc

    cost = pl.CostEstimate(
        flops=2 * C_pad * B_pad * D,
        transcendentals=0,
        bytes_accessed=int(B * D * in_item + C_pad * D * out_item
                           + 2 * B_pad * 4 + (1 + num_d) * C_pad * 4),
    )

    z_ch, y_ch = pl.pallas_call(
        kernel,
        out_shape=(
            jax.ShapeDtypeStruct((C_pad, D), out_dtype),
            jax.ShapeDtypeStruct((num_d * C_pad, 1), jnp.int32),
        ),
        grid_spec=pltpu.PrefetchScalarGridSpec(
            num_scalar_prefetch=0,
            grid=(num_d, num_tiles),
            in_specs=[
                pl.BlockSpec((C_pad, 1), lambda j, k: (0, 0)),   # uniq (resident)
                pl.BlockSpec((1, TB), lambda j, k: (0, k)),      # ch_ids tile
                pl.BlockSpec((1, TB), lambda j, k: (0, k)),      # y tile
                pl.BlockSpec((TB, TD), lambda j, k: (k, j)),     # z tile (no copy)
            ],
            out_specs=(
                pl.BlockSpec((C_pad, TD), lambda j, k: (0, j)),  # z_ch chunk
                pl.BlockSpec((C_pad, 1), lambda j, k: (j, 0)),   # y_ch per chunk
            ),
            scratch_shapes=scratch_shapes,
        ),
        compiler_params=pltpu.CompilerParams(
            dimension_semantics=("parallel", "arbitrary"),
            vmem_limit_bytes=vmem_limit,
        ),
        cost_estimate=cost,
    )(uniq_p, ch_row, y_row, z)

    return z_ch[:C, :], y_ch[:C, 0]


def _reference(z, y, ch_ids, reduction):
    z = np.asarray(z, dtype=np.float64)
    y = np.asarray(y)
    ch_ids = np.asarray(ch_ids)
    uniq = np.unique(ch_ids)
    zs, ys = [], []
    for c in uniq:
        idx = np.nonzero(ch_ids == c)[0]
        rows = z[idx]
        zs.append(rows.mean(axis=0) if reduction == "mean" else rows.sum(axis=0))
        ys.append(y[idx][0])
    return np.stack(zs), np.asarray(ys)


if __name__ == "__main__":
    root = jax.random.PRNGKey(0)
    k1, k2, k3, k4, k5 = jax.random.split(root, 5)
    ok = True

    # --- Test 1: tiny single-tile case, f32, both reductions -----------------
    batch, latent_dim = 8, 32
    z1 = jax.random.normal(k1, (batch, latent_dim), dtype=jnp.float32)
    ch1 = jnp.array([3, 1, 3, 2, 1, 3, 2, 1], dtype=jnp.int32)     # positive ids
    y1 = jax.random.randint(k2, (batch,), 0, 2, dtype=jnp.int32)
    z1_np = np.asarray(z1, dtype=np.float64)
    for reduction in ("mean", "sum"):
        z_ch, y_ch = channel_aggregator(z1, y1, ch1, reduction=reduction)
        z_ch = np.asarray(jax.block_until_ready(z_ch), dtype=np.float64)
        y_ch = np.asarray(jax.block_until_ready(y_ch))
        z_ref, y_ref = _reference(z1_np, np.asarray(y1), np.asarray(ch1), reduction)
        ok = ok and bool(np.allclose(z_ch, z_ref, rtol=1e-4, atol=1e-4))
        ok = ok and bool(np.array_equal(y_ch, y_ref.astype(np.int32)))

    # --- Test 2: multi-tile batch + D-split + ragged last tile, jit, f32 -----
    batch2, d2 = 300, 640
    z2 = jax.random.normal(k3, (batch2, d2), dtype=jnp.float32)
    ch2 = jax.random.randint(k4, (batch2,), 1, 6, dtype=jnp.int32)
    y2 = jax.random.randint(k5, (batch2,), 0, 4, dtype=jnp.int32)
    uniq2 = np.unique(np.asarray(ch2))

    agg_fn = jax.jit(functools.partial(
        channel_aggregator, reduction="mean", unique_ch_ids=uniq2, block_b=128))
    z_ch2, y_ch2 = agg_fn(z2, y2, ch2)
    z_ch2 = np.asarray(jax.block_until_ready(z_ch2), dtype=np.float64)
    y_ch2 = np.asarray(jax.block_until_ready(y_ch2))
    z_ref2, y_ref2 = _reference(np.asarray(z2, dtype=np.float64),
                                np.asarray(y2), np.asarray(ch2), "mean")
    ok = ok and bool(np.allclose(z_ch2, z_ref2, rtol=1e-4, atol=1e-4))
    ok = ok and bool(np.array_equal(y_ch2, y_ref2.astype(np.int32)))

    # --- Test 3: bf16 output (separate f32 accumulator scratch path), sum ----
    z3 = z2.astype(jnp.bfloat16)
    z_ch3, y_ch3 = channel_aggregator(z3, y2, ch2, reduction="sum",
                                      unique_ch_ids=uniq2, block_b=256)
    z_ch3 = jax.block_until_ready(z_ch3)
    y_ch3 = np.asarray(jax.block_until_ready(y_ch3))
    z3_np = np.asarray(z3.astype(jnp.float32), dtype=np.float64)
    z_ref3, y_ref3 = _reference(z3_np, np.asarray(y2), np.asarray(ch2), "sum")
    z_ch3_np = np.asarray(z_ch3.astype(jnp.float32), dtype=np.float64)
    ok = ok and bool(np.allclose(z_ch3_np, z_ref3, rtol=3e-2, atol=2e-1))
    ok = ok and bool(np.array_equal(y_ch3, y_ref3.astype(np.int32)))

    if ok:
        print("KERNEL_OK")
    else:
        print("KERNEL_MISMATCH")
</pallas_src>

<mosaic_0001>
module attributes {stable_mosaic.version = 11 : i64} {
  func.func @_channel_aggr_kernel(%arg0: i32, %arg1: i32, %arg2: memref<8x1xi32, #tpu.memory_space<vmem>>, %arg3: memref<1x128xi32, #tpu.memory_space<vmem>>, %arg4: memref<1x128xi32, #tpu.memory_space<vmem>>, %arg5: memref<128x32xf32, #tpu.memory_space<vmem>>, %arg6: memref<8x32xf32, #tpu.memory_space<vmem>>, %arg7: memref<8x1xi32, #tpu.memory_space<vmem>>, %arg8: memref<8x1xf32, #tpu.memory_space<vmem>>, %arg9: memref<8x1xi32, #tpu.memory_space<vmem>>) attributes {dimension_semantics = [#tpu.dimension_semantics<parallel>, #tpu.dimension_semantics<arbitrary>], iteration_bounds = array<i64: 1, 1>, scalar_prefetch = 0 : i64, scratch_operands = 2 : i64, tpu.core_type = #tpu.core_type<tc>, window_params = [{pipeline_mode = #tpu.pipeline_mode<synchronous>, transform_indices = @transform_0, window_bounds = array<i64: 8, 1>}, {transform_indices = @transform_1, window_bounds = array<i64: 1, 128>}, {transform_indices = @transform_2, window_bounds = array<i64: 1, 128>}, {transform_indices = @transform_3, window_bounds = array<i64: 128, 32>}, {transform_indices = @transform_4, window_bounds = array<i64: 8, 32>}, {transform_indices = @transform_5, window_bounds = array<i64: 8, 1>}]} {
    %c0_i32 = arith.constant 0 : i32
    %0 = arith.cmpi eq, %arg1, %c0_i32 : i32
    %1 = arith.extui %0 : i1 to i32
    %c0_i32_0 = arith.constant 0 : i32
    %2 = arith.cmpi ne, %1, %c0_i32_0 : i32
    scf.if %2 {
      %cst_22 = arith.constant 0.000000e+00 : f32
      %43 = vector.broadcast %cst_22 : f32 to vector<8x32xf32>
      %c0_23 = arith.constant 0 : index
      %c0_24 = arith.constant 0 : index
      %44 = vector.load %arg6[%c0_23, %c0_24] : memref<8x32xf32, #tpu.memory_space<vmem>>, vector<8x32xf32>
      tpu.vector_store %arg6[%c0_23, %c0_24], %43 {strides = array<i32>} : memref<8x32xf32, #tpu.memory_space<vmem>>, vector<8x32xf32>,
      %cst_25 = arith.constant 0.000000e+00 : f32
      %45 = vector.broadcast %cst_25 : f32 to vector<8x1xf32>
      %c0_26 = arith.constant 0 : index
      %c0_27 = arith.constant 0 : index
      %46 = vector.load %arg8[%c0_26, %c0_27] : memref<8x1xf32, #tpu.memory_space<vmem>>, vector<8x1xf32>
      tpu.vector_store %arg8[%c0_26, %c0_27], %45 {strides = array<i32>} : memref<8x1xf32, #tpu.memory_space<vmem>>, vector<8x1xf32>,
      %c0_28 = arith.constant 0 : index
      %c0_29 = arith.constant 0 : index
      %47 = vector.load %arg2[%c0_28, %c0_29] : memref<8x1xi32, #tpu.memory_space<vmem>>, vector<8x1xi32>
      %c0_i32_30 = arith.constant 0 : i32
      %48 = vector.broadcast %c0_i32_30 : i32 to vector<8x1xi32>
      %49 = arith.cmpi slt, %47, %48 : vector<8x1xi32>
      %c0_i32_31 = arith.constant 0 : i32
      %c2147483647_i32_32 = arith.constant 2147483647 : i32
      %50 = vector.broadcast %c0_i32_31 : i32 to vector<8x1xi32>
      %51 = vector.broadcast %c2147483647_i32_32 : i32 to vector<8x1xi32>
      %52 = arith.select %49, %50, %51 : vector<8x1xi1>, vector<8x1xi32>
      %c0_33 = arith.constant 0 : index
      %c0_34 = arith.constant 0 : index
      %53 = vector.load %arg9[%c0_33, %c0_34] : memref<8x1xi32, #tpu.memory_space<vmem>>, vector<8x1xi32>
      tpu.vector_store %arg9[%c0_33, %c0_34], %52 {strides = array<i32>} : memref<8x1xi32, #tpu.memory_space<vmem>>, vector<8x1xi32>,
    } else {
    }
    %c0 = arith.constant 0 : index
    %c0_1 = arith.constant 0 : index
    %3 = vector.load %arg3[%c0, %c0_1] : memref<1x128xi32, #tpu.memory_space<vmem>>, vector<1x128xi32>
    %c0_2 = arith.constant 0 : index
    %c0_3 = arith.constant 0 : index
    %4 = vector.load %arg2[%c0_2, %c0_3] : memref<8x1xi32, #tpu.memory_space<vmem>>, vector<8x1xi32>
    %5 = vector.broadcast %3 : vector<1x128xi32> to vector<8x128xi32>
    %6 = vector.broadcast %4 : vector<8x1xi32> to vector<8x128xi32>
    %7 = arith.cmpi eq, %5, %6 : vector<8x128xi32>
    %c0_4 = arith.constant 0 : index
    %c0_5 = arith.constant 0 : index
    %8 = vector.load %arg5[%c0_4, %c0_5] : memref<128x32xf32, #tpu.memory_space<vmem>>, vector<128x32xf32>
    %9 = tpu.iota {dimensions = array<i32: 0>} : vector<128x1xi32>
    %c128_i32 = arith.constant 128 : i32
    %10 = arith.muli %arg1, %c128_i32 : i32
    %11 = vector.broadcast %10 : i32 to vector<128x1xi32>
    %12 = arith.addi %11, %9 : vector<128x1xi32>
    %c8_i32 = arith.constant 8 : i32
    %13 = vector.broadcast %c8_i32 : i32 to vector<128x1xi32>
    %14 = arith.cmpi slt, %12, %13 : vector<128x1xi32>
    %cst = arith.constant 0.000000e+00 : f32
    %15 = vector.broadcast %cst : f32 to vector<128x32xf32>
    %16 = vector.shape_cast %14 : vector<128x1xi1> to vector<128x1xi1>
    %17 = vector.broadcast %16 : vector<128x1xi1> to vector<128x32xi1>
    %18 = arith.select %17, %8, %15 : vector<128x32xi1>, vector<128x32xf32>
    %19 = arith.extui %7 : vector<8x128xi1> to vector<8x128xi32>
    %20 = arith.sitofp %19 : vector<8x128xi32> to vector<8x128xf32>
    %c0_6 = arith.constant 0 : index
    %c0_7 = arith.constant 0 : index
    %21 = vector.load %arg6[%c0_6, %c0_7] : memref<8x32xf32, #tpu.memory_space<vmem>>, vector<8x32xf32>
    %cst_8 = arith.constant dense<0.000000e+00> : vector<8x32xf32>
    %22 = tpu.matmul %20, %18, %cst_8 {dimension_numbers = #tpu.dot_dimension_numbers<[1], [0], [0], [1], [0, 0, 1, 1], [], []>} : vector<8x128xf32>, vector<128x32xf32>, vector<8x32xf32> -> vector<8x32xf32>
    %23 = arith.addf %21, %22 : vector<8x32xf32>
    %c0_9 = arith.constant 0 : index
    %c0_10 = arith.constant 0 : index
    %24 = vector.load %arg6[%c0_9, %c0_10] : memref<8x32xf32, #tpu.memory_space<vmem>>, vector<8x32xf32>
    tpu.vector_store %arg6[%c0_9, %c0_10], %23 {strides = array<i32>} : memref<8x32xf32, #tpu.memory_space<vmem>>, vector<8x32xf32>,
    %c0_11 = arith.constant 0 : index
    %c0_12 = arith.constant 0 : index
    %25 = vector.load %arg8[%c0_11, %c0_12] : memref<8x1xf32, #tpu.memory_space<vmem>>, vector<8x1xf32>
    %26 = arith.extui %7 : vector<8x128xi1> to vector<8x128xi32>
    %27 = arith.sitofp %26 : vector<8x128xi32> to vector<8x128xf32>
    %cst_13 = arith.constant dense<0.000000e+00> : vector<8xf32>
    %28 = vector.multi_reduction <add>, %27, %cst_13 [1] : vector<8x128xf32> to vector<8xf32>
    %29 = vector.shape_cast %28 : vector<8xf32> to vector<8x1xf32>
    %30 = arith.addf %25, %29 : vector<8x1xf32>
    %c0_14 = arith.constant 0 : index
    %c0_15 = arith.constant 0 : index
    %31 = vector.load %arg8[%c0_14, %c0_15] : memref<8x1xf32, #tpu.memory_space<vmem>>, vector<8x1xf32>
    tpu.vector_store %arg8[%c0_14, %c0_15], %30 {strides = array<i32>} : memref<8x1xf32, #tpu.memory_space<vmem>>, vector<8x1xf32>,
    %c0_16 = arith.constant 0 : index
    %c0_17 = arith.constant 0 : index
    %32 = vector.load %arg9[%c0_16, %c0_17] : memref<8x1xi32, #tpu.memory_space<vmem>>, vector<8x1xi32>
    %33 = vector.shape_cast %32 : vector<8x1xi32> to vector<1x8x1xi32>
    %cst_18 = arith.constant dense<-2147483648> : vector<1xi32>
    %34 = vector.multi_reduction <maxsi>, %33, %cst_18 [1, 2] : vector<1x8x1xi32> to vector<1xi32>
    %35 = vector.shape_cast %34 : vector<1xi32> to vector<1x1x1xi32>
    %36 = vector.extract %35[0, 0, 0] : i32 from vector<1x1x1xi32>
    %c2147483647_i32 = arith.constant 2147483647 : i32
    %37 = arith.cmpi eq, %36, %c2147483647_i32 : i32
    %38 = arith.extui %37 : i1 to i32
    %c0_i32_19 = arith.constant 0 : i32
    %39 = arith.cmpi ne, %38, %c0_i32_19 : i32
    scf.if %39 {
      %c0_22 = arith.constant 0 : index
      %c0_23 = arith.constant 0 : index
      %43 = vector.load %arg4[%c0_22, %c0_23] : memref<1x128xi32, #tpu.memory_space<vmem>>, vector<1x128xi32>
      %44 = tpu.iota {dimensions = array<i32: 1>} : vector<8x128xi32>
      %c65536_i32 = arith.constant 65536 : i32
      %45 = vector.broadcast %c65536_i32 : i32 to vector<8x128xi32>
      %46 = arith.muli %44, %45 : vector<8x128xi32>
      %47 = vector.broadcast %43 : vector<1x128xi32> to vector<8x128xi32>
      %48 = arith.addi %46, %47 : vector<8x128xi32>
      %c2147483647_i32_24 = arith.constant 2147483647 : i32
      %49 = vector.broadcast %c2147483647_i32_24 : i32 to vector<8x128xi32>
      %50 = arith.select %7, %48, %49 : vector<8x128xi1>, vector<8x128xi32>
      %cst_25 = arith.constant dense<2147483647> : vector<8xi32>
      %51 = vector.multi_reduction <minsi>, %50, %cst_25 [1] : vector<8x128xi32> to vector<8xi32>
      %52 = vector.shape_cast %51 : vector<8xi32> to vector<8x1xi32>
      %c0_26 = arith.constant 0 : index
      %c0_27 = arith.constant 0 : index
      %53 = vector.load %arg9[%c0_26, %c0_27] : memref<8x1xi32, #tpu.memory_space<vmem>>, vector<8x1xi32>
      %c2147483647_i32_28 = arith.constant 2147483647 : i32
      %54 = vector.broadcast %c2147483647_i32_28 : i32 to vector<8x1xi32>
      %55 = arith.cmpi eq, %53, %54 : vector<8x1xi32>
      %c0_29 = arith.constant 0 : index
      %c0_30 = arith.constant 0 : index
      %56 = vector.load %arg9[%c0_29, %c0_30] : memref<8x1xi32, #tpu.memory_space<vmem>>, vector<8x1xi32>
      %57 = arith.select %55, %52, %56 : vector<8x1xi1>, vector<8x1xi32>
      %c0_31 = arith.constant 0 : index
      %c0_32 = arith.constant 0 : index
      %58 = vector.load %arg9[%c0_31, %c0_32] : memref<8x1xi32, #tpu.memory_space<vmem>>, vector<8x1xi32>
      tpu.vector_store %arg9[%c0_31, %c0_32], %57 {strides = array<i32>} : memref<8x1xi32, #tpu.memory_space<vmem>>, vector<8x1xi32>,
    } else {
    }
    %c0_i32_20 = arith.constant 0 : i32
    %40 = arith.cmpi eq, %arg1, %c0_i32_20 : i32
    %41 = arith.extui %40 : i1 to i32
    %c0_i32_21 = arith.constant 0 : i32
    %42 = arith.cmpi ne, %41, %c0_i32_21 : i32
    scf.if %42 {
      %c0_22 = arith.constant 0 : index
      %c0_23 = arith.constant 0 : index
      %43 = vector.load %arg6[%c0_22, %c0_23] : memref<8x32xf32, #tpu.memory_space<vmem>>, vector<8x32xf32>
      %c0_24 = arith.constant 0 : index
      %c0_25 = arith.constant 0 : index
      %44 = vector.load %arg8[%c0_24, %c0_25] : memref<8x1xf32, #tpu.memory_space<vmem>>, vector<8x1xf32>
      %cst_26 = arith.constant 1.000000e+00 : f32
      %45 = vector.broadcast %cst_26 : f32 to vector<8x1xf32>
      %46 = arith.maximumf %44, %45 : vector<8x1xf32>
      %47 = tpu.reciprocal %46 {approx = true} : vector<8x1xf32> -> vector<8x1xf32>
      %48 = arith.mulf %46, %47 : vector<8x1xf32>
      %cst_27 = arith.constant 2.000000e+00 : f32
      %49 = vector.broadcast %cst_27 : f32 to vector<8x1xf32>
      %50 = arith.subf %49, %48 : vector<8x1xf32>
      %51 = arith.mulf %47, %50 : vector<8x1xf32>
      %52 = vector.broadcast %51 : vector<8x1xf32> to vector<8x32xf32>
      %53 = arith.mulf %43, %52 : vector<8x32xf32>
      %c0_28 = arith.constant 0 : index
      %c0_29 = arith.constant 0 : index
      %54 = vector.load %arg6[%c0_28, %c0_29] : memref<8x32xf32, #tpu.memory_space<vmem>>, vector<8x32xf32>
      tpu.vector_store %arg6[%c0_28, %c0_29], %53 {strides = array<i32>} : memref<8x32xf32, #tpu.memory_space<vmem>>, vector<8x32xf32>,
      %c0_30 = arith.constant 0 : index
      %c0_31 = arith.constant 0 : index
      %55 = vector.load %arg9[%c0_30, %c0_31] : memref<8x1xi32, #tpu.memory_space<vmem>>, vector<8x1xi32>
      %c2147483647_i32_32 = arith.constant 2147483647 : i32
      %56 = vector.broadcast %c2147483647_i32_32 : i32 to vector<8x1xi32>
      %57 = arith.cmpi eq, %55, %56 : vector<8x1xi32>
      %c65535_i32 = arith.constant 65535 : i32
      %58 = vector.broadcast %c65535_i32 : i32 to vector<8x1xi32>
      %59 = arith.andi %55, %58 : vector<8x1xi32>
      %c0_i32_33 = arith.constant 0 : i32
      %60 = vector.broadcast %c0_i32_33 : i32 to vector<8x1xi32>
      %61 = arith.select %57, %60, %59 : vector<8x1xi1>, vector<8x1xi32>
      %c0_34 = arith.constant 0 : index
      %c0_35 = arith.constant 0 : index
      %62 = vector.load %arg7[%c0_34, %c0_35] : memref<8x1xi32, #tpu.memory_space<vmem>>, vector<8x1xi32>
      tpu.vector_store %arg7[%c0_34, %c0_35], %61 {strides = array<i32>} : memref<8x1xi32, #tpu.memory_space<vmem>>, vector<8x1xi32>,
    } else {
    }
    return
  }
  func.func @transform_0(%arg0: i32, %arg1: i32) -> (i32, i32) {
    %c0_i32 = arith.constant 0 : i32
    %c0_i32_0 = arith.constant 0 : i32
    %c0_i32_1 = arith.constant 0 : i32
    return %c0_i32, %c0_i32_0 : i32, i32
  }
  func.func @transform_1(%arg0: i32, %arg1: i32) -> (i32, i32) {
    %c0_i32 = arith.constant 0 : i32
    %c0_i32_0 = arith.constant 0 : i32
    return %c0_i32, %arg1 : i32, i32
  }
  func.func @transform_2(%arg0: i32, %arg1: i32) -> (i32, i32) {
    %c0_i32 = arith.constant 0 : i32
    %c0_i32_0 = arith.constant 0 : i32
    return %c0_i32, %arg1 : i32, i32
  }
  func.func @transform_3(%arg0: i32, %arg1: i32) -> (i32, i32) {
    %c0_i32 = arith.constant 0 : i32
    return %arg1, %arg0 : i32, i32
  }
  func.func @transform_4(%arg0: i32, %arg1: i32) -> (i32, i32) {
    %c0_i32 = arith.constant 0 : i32
    %c0_i32_0 = arith.constant 0 : i32
    return %c0_i32, %arg0 : i32, i32
  }
  func.func @transform_5(%arg0: i32, %arg1: i32) -> (i32, i32) {
    %c0_i32 = arith.constant 0 : i32
    %c0_i32_0 = arith.constant 0 : i32
    return %arg0, %c0_i32 : i32, i32
  }
}

</mosaic_0001>

<bundles_post_ra>
// kernel: tpu_custom_call.1
= control target key start
LH: loop header
LB: loop body
LE: loop exit
PB: predicated region body
PF: predicated region fallthrough
CT: control target
= control target key end

     0   :  { %vm26_vm0 = vcmask 7168   ;;  %v385_v1 = vmov 0   ;;  %s462_s0 = inlined_call_operand.vmem [shape: s32[8,1], index: 0, kind: input, shape index: {}]   ;;  %s463_s1 = inlined_call_operand.vmem [shape: s32[1,128], index: 1, kind: input, shape index: {}]   ;;  %s464_s2 = inlined_call_operand.vmem [shape: s32[1,128], index: 2, kind: input, shape index: {}]   ;;  %s465_s3 = inlined_call_operand.vmem [shape: f32[8,32], index: 3, kind: input, shape index: {}]   ;;  %s466_s4 = inlined_call_operand.hbm [shape: f32[8,32], index: 4, kind: output, shape index: {0}]   ;;  %s467_s5 = inlined_call_operand.vmem [shape: s32[8,1], index: 5, kind: output, shape index: {1}]  }
   0x1   :  { %v33_v0 = vld [vmem:[%s462_s0] sm:$0xff]  ;;  %357 = vset.pattern.permute.xlu0 %v385_v1 }
   0x2   :  { %vm29_vm1 = vcmp.lt.s32.totalorder %v33_v0, 0 }
   0x3   :  { %11 = vsyncpa [#allocation5], 0  ;;  %v386_v2 = vmov 0.0   ;;  %v42_v3 = vld [vmem:[%s465_s3] sm:$0xff]  ;;  %39 = vperm.xlu0 %357, %v33_v0   ;;  %v387_v4 = vmov 2147483647  }
   0x4   :  { %344 = vmatprep.subr.mxu0 %v386_v2  ;;  %27 = vst.msk [vmem:[#allocation2] sm:$0xff] %vm26_vm0, %v386_v2  ;;  %v30_v5 = vsel %vm29_vm1, 0, %v387_v4  ;;  %vm388_vm2 = vmmov 0   ;;  %v337_v10 = vld [vmem:[%s463_s1] ss:$0 sm:$0xff]  ;;  %v389_v12 = vmov 1.0  }
   0x5   :  { %345 = vmatpush3.msra.mxu0 %v42_v3  ;;  %31 = vst.msk [vmem:[#allocation3] sm:$0xff] %vm26_vm0, %v30_v5  ;;  %346 = vmatprep.mubr.msk.f32.mxu0 %vm388_vm2, %v386_v2  ;;  %vm24_vm5 = vcmask 261120  }
   0x6   :  { %25 = vst.msk [vmem:[#allocation4] sm:$0xff] %vm24_vm5, %v386_v2 }
   0xb   :  { %v233_v22 = vld [vmem:[#allocation2] sm:$0xff] }
   0xc   :  { %v239_v6 = vld [vmem:[#allocation3] sm:$0xff] }
   0xd   :  { %v240_v7 = vsel %vm26_vm0, %v239_v6, 2147483648  ;;  %v159_v32 = vld [vmem:[#allocation4] sm:$0xff] }
   0xe   :  { %v242_v8 = vshra.s32 %v240_v7, 16  ;;  %v241_v13 = vand.u32 65535, %v240_v7 }
  0x10   :  { %v244_v9 = vcvt.s32.f32 %v242_v8  ;;  %v243_v14 = vcvt.s32.f32 %v241_v13 }
  0x22   :  { %245 = vmax.xlane.f32.xlu0 %v244_v9 }
  0x82   :  { %v40_v11 = vpop.permute.xlu0 %39 }
  0x83   :  { %vm41_vm3 = vcmp.eq.s32.totalorder %v337_v10, %v40_v11 }
  0x84   :  { %347 = vmatmul.mubr.msk.f32.vlgmr.msra.gmra.mrb[0].mxu0 %vm41_vm3, %v389_v12  ;;  %v338_v17 = vsel %vm41_vm3, 1.0, %v386_v2 }
  0xaf   :  { %v246_v15 = vpop.xlane.xlu0 %245 }
  0xb0   :  { %vm247_vm4 = vcmp.eq.f32.partialorder %v244_v9, %v246_v15  ;;  %v252_v18 = vcvt.f32.s32 %v246_v15 }
  0xb1   :  { %v248_v16 = vsel %vm247_vm4, %v243_v14, -inf }
  0xb2   :  { %249 = vmax.xlane.f32.xlu1 %v248_v16  ;;  %v253_v20 = vshll.u32 %v252_v18, 16 }
  0xb6   :  { %234 = vadd.xlane.f32.xlu1 %v338_v17 }
 0x13f   :  { %v250_v19 = vpop.xlane.xlu1 %249 }
 0x140   :  { %v251_v21 = vcvt.f32.s32 %v250_v19 }
 0x142   :  { %v254_v23 = vadd.s32 %v253_v20, %v251_v21 }
 0x143   :  { %v235_v24 = vpop.xlane.xlu1 %234 }
 0x144   :  { %v255_v25 = vrot.slane %v254_v23, 4  ;;  %v236_v26 = vadd.f32 %v235_v24, %v233_v22 }
 0x146   :  { %238 = vst.msk [vmem:[#allocation2] sm:$0xff] %vm26_vm0, %v236_v26  ;;  %vm256_vm6 = vcmp.gt.s32.totalorder %v254_v23, %v255_v25 }
 0x147   :  { %v257_v27 = vsel %vm256_vm6, %v254_v23, %v255_v25 }
 0x148   :  { %v258_v28 = vrot.slane %v257_v27, 2 }
 0x14a   :  { %vm259_vm7 = vcmp.gt.s32.totalorder %v257_v27, %v258_v28 }
 0x14b   :  { %v260_v29 = vsel %vm259_vm7, %v257_v27, %v258_v28 }
 0x14c   :  { %v261_v30 = vrot.slane %v260_v29, 1 }
 0x14e   :  { %vm262_vm8 = vcmp.gt.s32.totalorder %v260_v29, %v261_v30 }
 0x14f   :  { %v263_v31 = vsel %vm262_vm8, %v260_v29, %v261_v30 }
 0x150   :  { %349 = vpush %v263_v31 }
 0x157   :  { %v226_v33 = vpop.f32.mrb[0].mxu0 }
 0x158   :  { %v230_v34 = vadd.f32 %v226_v33, %v159_v32  ;;  %v348_v35 = vpop.f32.mrb[1].mxu0 }
 0x15a   :  { %232 = vst.msk [vmem:[#allocation4] sm:$0xff] %vm24_vm5, %v230_v34 }
 0x181   :  { %s350_s1 = spop %349 }
 0x182   :  { %p340_p0 = scmp.ne.s32.totalorder %s350_s1, 2147483647 }
 0x183   :  { %v270_v36 = vlaneseq (!%p340_p0)  ;;  %v341_v38 = vld [vmem:[%s464_s2] ss:$0 sm:$0xff] (!%p340_p0)  ;;  %v293_v49 = vld [vmem:[#allocation3] sm:$0xff] (!%p340_p0) }
 0x184   :  { %268 = sbr.rel (%p340_p0) target bundleno = 692 (0x2b4), region = 25  ;;  %vm294_vm10 = vcmp.eq.s32.totalorder (!%p340_p0), %v293_v49, 2147483647 }
 0x185   :  { %v271_v37 = vand.u32 (!%p340_p0), 127, %v270_v36 }
 0x187   :  { %v272_v39 = vmul.u32 (!%p340_p0), 65536, %v271_v37 }
 0x189   :  { %v277_v40 = vadd.s32 (!%p340_p0), %v341_v38, %v272_v39 }
 0x18b   :  { %v278_v41 = vsel %vm41_vm3, %v277_v40, 2147483647 }
 0x18c   :  { %v280_v42 = vshra.s32 %v278_v41, 16  ;;  %v279_v44 = vand.u32 65535, %v278_v41 }
 0x18e   :  { %v282_v43 = vcvt.s32.f32 %v280_v42  ;;  %v281_v45 = vcvt.s32.f32 %v279_v44 }
 0x190   :  { %283 = vmin.xlane.f32.xlu0 %v282_v43 }
 0x21d   :  { %v284_v46 = vpop.xlane.xlu0 %283 }
 0x21e   :  { %vm285_vm9 = vcmp.eq.f32.partialorder %v282_v43, %v284_v46  ;;  %v290_v48 = vcvt.f32.s32 %v284_v46 }
 0x21f   :  { %v286_v47 = vsel %vm285_vm9, %v281_v45, inf }
 0x220   :  { %287 = vmin.xlane.f32.xlu0 %v286_v47  ;;  %v291_v51 = vshll.u32 %v290_v48, 16 }
 0x2ad   :  { %v288_v50 = vpop.xlane.xlu0 %287 }
 0x2ae   :  { %v289_v52 = vcvt.f32.s32 %v288_v50 }
 0x2b0   :  { %v292_v53 = vadd.s32 %v291_v51, %v289_v52 }
 0x2b2   :  { %v295_v54 = vsel %vm294_vm10, %v292_v53, %v293_v49 }
 0x2b3   :  { %296 = vst.msk [vmem:[#allocation3] sm:$0xff] %vm26_vm0, %v295_v54 }
 0x2b4 PF:  { %358 = vset.pattern.permute.xlu0 %v385_v1  ;;  %v301_v55 = vld [vmem:[#allocation2] sm:$0xff]  ;;  %v300_v0 = vld [vmem:[#allocation4] sm:$0xff]  ;;  %s390_s25 = smov [#allocation4]  }
 0x2b5   :  { %v302_v56 = vmax.f32 %v301_v55, 1.0  ;;  %s325_s26 = sshll.u32 %s390_s25, 4  ;;  %s326_s26 = int_to_ptr.vmem [resolvable:$true] %s325_s26 }
 0x2b6   :  { %s361_s27 = scalar_lea.vmem %s326_s26, 128  ;;  %p366_p2 = scmp.lt.s32.totalorder %s326_s26, %s326_s26 }
 0x2b7   :  { %359 = vrcp.f32 %v302_v56  ;;  %p362_p1 = scmp.ne.s32.totalorder %s326_s26, %s361_s27  ;;  %p367_p3 = scmp.lt.s32.totalorder %s361_s27, %s361_s27 }
 0x2b9   :  { %p368_p4 = por %p367_p3, %p366_p2 }
 0x2ba   :  { %v314_v61 = vld [vmem:[#allocation3] sm:$0xff] }
 0x2bb   :  { %v316_v62 = vand.u32 65535, %v314_v61  ;;  %vm315_vm11 = vcmp.eq.s32.totalorder %v314_v61, 2147483647  ;;  %p369_p5 = pnand %p368_p4, %p362_p1 }
 0x2bd   :  { %v317_v63 = vsel %vm315_vm11, 0, %v316_v62 }
 0x2be   :  { %318 = vst.msk [vmem:[%s467_s5] sm:$0xff] %vm26_vm0, %v317_v63 }
 0x2c1   :  { %v360_v57 = vpop.eup %359 }
 0x2c2   :  { %v304_v58 = vmul.f32 %v360_v57, %v302_v56 }
 0x2c4   :  { %v305_v59 = vsub.f32 2.0, %v304_v58 }
 0x2c6   :  { %v306_v60 = vmul.f32 %v360_v57, %v305_v59 }
 0x2c8   :  { %309 = vperm.xlu0 %358, %v306_v60  }
 0x347   :  { %v310_v1 = vpop.permute.xlu0 %309 }
 0x348   :  { %v312_v2 = vmul.f32 %v310_v1, %v300_v0 }
 0x34a   :  { %313 = vst.msk [vmem:[#allocation4] sm:$0xff] %vm24_vm5, %v312_v2 }
 0x34b   :  { %372 = shalt.err (!%p369_p5)
}
 0x34c   :  { %s373_s30 = scalar_lea.hbm %s466_s4, 128 }
 0x34d   :  { %p374_p6 = scmp.ne.s32.totalorder %s466_s4, %s373_s30  ;;  %p377_p7 = scmp.lt.u32.totalorder %s373_s30, %s466_s4 }
 0x34f   :  { %p379_p8 = pnand %p377_p7, %p374_p6 }
 0x351   :  { %382 = shalt.err (!%p379_p8)
}
 0x352   :  { %328 = dma.vmem_to_hbm [thread:$0]  %s326_s26, 128, %s466_s4, [#allocation5]  }
 0x353   :  { %383 = dma.done.wait [#allocation5], 128  }
 0x354   :  { %384 = vsyncadd [#allocation5], 4294967168 }
 0x355   :  { %336 = vsyncpa [#allocation5], 1 }

</bundles_post_ra>
